<compile_context>
chip_gen: v7x
topology: tpu7x:2x2x1
jax: 0.10.0
libtpu: 0.0.40
codegen_flags: <defaults>
</compile_context>

<pallas_src>
import functools

import numpy as np
import jax
import jax.numpy as jnp
from jax.experimental import pallas as pl
from jax.experimental.pallas import tpu as pltpu


def _awru_kernel(x_ref, mask_ref, w1_ref, b1_ref, w2_ref, b2_ref,
                 rs_ref, xs_ref, out_ref, *, H, W, C, K, L):
    """One fused batch-slab per grid step.

    x_ref    : (C, L)        input slab, L = (batch-per-step) * H * W on lanes
    mask_ref : (K*K, L)      per-tap validity mask (emulates zero padding)
    w*_ref   : (C, K*K*C)    im2col weight matrix (row = cout, col = tap*C+cin)
    b*_ref   : (C, 1)        biases
    rs_ref   : (1,) in SMEM  res_scale
    xs_ref   : (1,) in SMEM  x_scale
    out_ref  : (C, L)
    """
    p = K // 2

    x = x_ref[...]                       # (C, L)
    masks = mask_ref[...]                # (K*K, L) -- loaded once, both convs

    def conv(src, w_ref, b_ref):
        rows = []
        for dy in range(K):
            for dx in range(K):
                t = dy * K + dx
                sy, sx = dy - p, dx - p
                if sy == 0 and sx == 0:
                    rows.append(src)                         # center tap
                else:
                    # want shifted[c, j] = src[c, j + sy*W + sx]; roll moves
                    # element i to (i + shift) % L, so shift = -(sy*W+sx) % L.
                    shift = (-(sy * W + sx)) % L
                    rolled = pltpu.roll(src, shift, axis=1)  # XLU, cheap
                    rows.append(rolled * masks[t:t + 1, :])  # zero-pad mask
        cols = jnp.concatenate(rows, axis=0)                 # (K*K*C, L) im2col
        y = jnp.dot(w_ref[...], cols,                        # single MXU dot
                    preferred_element_type=jnp.float32)
        return y + b_ref[...]                                # bias (C,1)

    h1 = jnp.maximum(conv(x, w1_ref, b1_ref), 0.0)           # conv1 + ReLU
    body = conv(h1, w2_ref, b2_ref)                          # conv2

    out_ref[...] = rs_ref[0] * body + xs_ref[0] * x


def _tap_masks(H, W, K, bn):
    """mask[tap, b*H*W + y*W + x] = 1 iff (y+dy-p, x+dx-p) lies inside HxW."""
    p = K // 2
    hw = H * W
    m = np.zeros((K * K, hw), np.float32)
    ys = np.arange(H)
    xs = np.arange(W)
    for dy in range(K):
        for dx in range(K):
            sy, sx = dy - p, dx - p
            vy = ((ys + sy >= 0) & (ys + sy < H)).astype(np.float32)
            vx = ((xs + sx >= 0) & (xs + sx < W)).astype(np.float32)
            m[dy * K + dx] = (vy[:, None] * vx[None, :]).reshape(-1)
    return jnp.asarray(np.tile(m, (1, bn)))      # (K*K, bn*H*W)


def awru_forward(x_nchw, w1, b1, w2, b2, res_scale, x_scale, kernel_size):
    """x_nchw: (N, C, H, W) f32.  w1/w2: (Cout, Cin, kh, kw) (PyTorch OIHW)."""
    N, C, H, W = x_nchw.shape
    K = kernel_size
    HW = H * W

    # Grid: fuse the batch onto the lane axis, but keep >= 2 parallel steps
    # when the batch allows it so both v7x TensorCores get work.
    G = 2 if (N >= 2 and N % 2 == 0) else 1
    BN = N // G                      # batch elements fused per grid step
    L = BN * HW                      # lane width per step (multiple of 128)

    # (N, C, H, W) -> (C, N*H*W): lane index = n*HW + y*W + x.  Tiny transpose.
    x_flat = (jnp.transpose(x_nchw, (1, 0, 2, 3))
              .reshape(C, N * HW).astype(jnp.float32))

    # OIHW -> (C_out, K*K*C_in), column order = tap-major then cin,
    # matching the im2col row order built inside the kernel.
    def prep_w(w):
        return (jnp.transpose(w, (0, 2, 3, 1))
                .reshape(C, K * K * C).astype(jnp.float32))

    w1_m, w2_m = prep_w(w1), prep_w(w2)
    b1_c = b1.reshape(C, 1).astype(jnp.float32)
    b2_c = b2.reshape(C, 1).astype(jnp.float32)
    rs = jnp.asarray(res_scale, jnp.float32).reshape(1)
    xs = jnp.asarray(x_scale, jnp.float32).reshape(1)
    masks = _tap_masks(H, W, K, BN)                       # (K*K, L)

    kernel = functools.partial(_awru_kernel, H=H, W=W, C=C, K=K, L=L)

    out_flat = pl.pallas_call(
        kernel,
        out_shape=jax.ShapeDtypeStruct((C, N * HW), jnp.float32),
        grid_spec=pltpu.PrefetchScalarGridSpec(
            num_scalar_prefetch=0,
            grid=(G,),
            in_specs=[
                pl.BlockSpec((C, L), lambda g: (0, g)),            # x slab
                pl.BlockSpec((K * K, L), lambda g: (0, 0)),        # masks
                pl.BlockSpec((C, K * K * C), lambda g: (0, 0)),    # w1
                pl.BlockSpec((C, 1), lambda g: (0, 0)),            # b1
                pl.BlockSpec((C, K * K * C), lambda g: (0, 0)),    # w2
                pl.BlockSpec((C, 1), lambda g: (0, 0)),            # b2
                pl.BlockSpec(memory_space=pltpu.SMEM),             # res_scale
                pl.BlockSpec(memory_space=pltpu.SMEM),             # x_scale
            ],
            out_specs=pl.BlockSpec((C, L), lambda g: (0, g)),
        ),
        compiler_params=pltpu.CompilerParams(
            dimension_semantics=("parallel",)),
    )(x_flat, masks, w1_m, b1_c, w2_m, b2_c, rs, xs)

    # (C, N*H*W) -> (N, C, H, W)
    return jnp.transpose(out_flat.reshape(C, N, H, W), (1, 0, 2, 3))


def weight_norm(v, g):
    """PyTorch weight_norm (dim=0): w = g * v / ||v|| per output channel."""
    norm = jnp.sqrt(jnp.sum(v * v, axis=(1, 2, 3), keepdims=True))
    return g.reshape(-1, 1, 1, 1) * v / norm


def _reference_awru(x, w1, b1, w2, b2, rs, xs, K):
    """Pure-JAX reference using lax conv, NCHW / OIHW."""
    p = K // 2
    dn = jax.lax.conv_dimension_numbers(x.shape, w1.shape,
                                        ("NCHW", "OIHW", "NCHW"))
    y = jax.lax.conv_general_dilated(x, w1, (1, 1), [(p, p), (p, p)],
                                     dimension_numbers=dn)
    y = y + b1.reshape(1, -1, 1, 1)
    y = jnp.maximum(y, 0.0)
    y = jax.lax.conv_general_dilated(y, w2, (1, 1), [(p, p), (p, p)],
                                     dimension_numbers=dn)
    y = y + b2.reshape(1, -1, 1, 1)
    return rs * y + xs * x


if __name__ == "__main__":
    # Small shapes consistent with the module.
    N, nf, H, W = 2, 4, 16, 16
    K = 3

    key = jax.random.PRNGKey(0)
    kx, kv1, kb1, kv2, kb2 = jax.random.split(key, 5)

    x = jax.random.normal(kx, (N, nf, H, W), jnp.float32)

    # Deterministic synthetic parameters (weight-normalized convs).
    v1 = jax.random.normal(kv1, (nf, nf, K, K), jnp.float32) * 0.1
    v2 = jax.random.normal(kv2, (nf, nf, K, K), jnp.float32) * 0.1
    g1 = jnp.sqrt(jnp.sum(v1 * v1, axis=(1, 2, 3)))   # weight_norm init
    g2 = jnp.sqrt(jnp.sum(v2 * v2, axis=(1, 2, 3)))
    w1 = weight_norm(v1, g1)
    w2 = weight_norm(v2, g2)
    b1 = jax.random.normal(kb1, (nf,), jnp.float32) * 0.01
    b2 = jax.random.normal(kb2, (nf,), jnp.float32) * 0.01
    res_scale = 1.0  # Scale(1)
    x_scale = 1.0    # Scale(1)

    out = awru_forward(x, w1, b1, w2, b2, res_scale, x_scale, K)
    out = jax.block_until_ready(out)

    ref = _reference_awru(x, w1, b1, w2, b2, res_scale, x_scale, K)
    ref = jax.block_until_ready(ref)

    assert out.shape == (N, nf, H, W)
    assert jnp.allclose(out, ref, atol=1e-4, rtol=1e-4), "mismatch vs reference"
    print("KERNEL_OK")
</pallas_src>

<mosaic_0001>
module attributes {stable_mosaic.version = 11 : i64} {
  func.func @_awru_kernel(%arg0: i32, %arg1: memref<4x256xf32, #tpu.memory_space<vmem>>, %arg2: memref<9x256xf32, #tpu.memory_space<vmem>>, %arg3: memref<4x36xf32, #tpu.memory_space<vmem>>, %arg4: memref<4x1xf32, #tpu.memory_space<vmem>>, %arg5: memref<4x36xf32, #tpu.memory_space<vmem>>, %arg6: memref<4x1xf32, #tpu.memory_space<vmem>>, %arg7: memref<1xf32, #tpu.memory_space<smem>>, %arg8: memref<1xf32, #tpu.memory_space<smem>>, %arg9: memref<4x256xf32, #tpu.memory_space<vmem>>) attributes {dimension_semantics = [#tpu.dimension_semantics<parallel>], iteration_bounds = array<i64: 2>, scalar_prefetch = 0 : i64, scratch_operands = 0 : i64, tpu.core_type = #tpu.core_type<tc>, window_params = [{transform_indices = @transform_0, window_bounds = array<i64: 4, 256>}, {pipeline_mode = #tpu.pipeline_mode<synchronous>, transform_indices = @transform_1, window_bounds = array<i64: 9, 256>}, {pipeline_mode = #tpu.pipeline_mode<synchronous>, transform_indices = @transform_2, window_bounds = array<i64: 4, 36>}, {pipeline_mode = #tpu.pipeline_mode<synchronous>, transform_indices = @transform_3, window_bounds = array<i64: 4, 1>}, {pipeline_mode = #tpu.pipeline_mode<synchronous>, transform_indices = @transform_4, window_bounds = array<i64: 4, 36>}, {pipeline_mode = #tpu.pipeline_mode<synchronous>, transform_indices = @transform_5, window_bounds = array<i64: 4, 1>}, {transform_indices = @transform_6, window_bounds = array<i64: 1>}, {transform_indices = @transform_7, window_bounds = array<i64: 1>}, {transform_indices = @transform_8, window_bounds = array<i64: 4, 256>}]} {
    %c0 = arith.constant 0 : index
    %c0_0 = arith.constant 0 : index
    %0 = vector.load %arg1[%c0, %c0_0] : memref<4x256xf32, #tpu.memory_space<vmem>>, vector<4x256xf32>
    %c0_1 = arith.constant 0 : index
    %c0_2 = arith.constant 0 : index
    %1 = vector.load %arg2[%c0_1, %c0_2] : memref<9x256xf32, #tpu.memory_space<vmem>>, vector<9x256xf32>
    %c17_i32 = arith.constant 17 : i32
    %2 = tpu.dynamic_rotate %0 by %c17_i32 dim 1 : vector<4x256xf32>, i32 -> vector<4x256xf32>
    %3 = vector.extract_strided_slice %1 {offsets = [0, 0], sizes = [1, 256], strides = [1, 1]} : vector<9x256xf32> to vector<1x256xf32>
    %4 = vector.broadcast %3 : vector<1x256xf32> to vector<4x256xf32>
    %5 = arith.mulf %2, %4 : vector<4x256xf32>
    %c16_i32 = arith.constant 16 : i32
    %6 = tpu.dynamic_rotate %0 by %c16_i32 dim 1 : vector<4x256xf32>, i32 -> vector<4x256xf32>
    %7 = vector.extract_strided_slice %1 {offsets = [1, 0], sizes = [1, 256], strides = [1, 1]} : vector<9x256xf32> to vector<1x256xf32>
    %8 = vector.broadcast %7 : vector<1x256xf32> to vector<4x256xf32>
    %9 = arith.mulf %6, %8 : vector<4x256xf32>
    %c15_i32 = arith.constant 15 : i32
    %10 = tpu.dynamic_rotate %0 by %c15_i32 dim 1 : vector<4x256xf32>, i32 -> vector<4x256xf32>
    %11 = vector.extract_strided_slice %1 {offsets = [2, 0], sizes = [1, 256], strides = [1, 1]} : vector<9x256xf32> to vector<1x256xf32>
    %12 = vector.broadcast %11 : vector<1x256xf32> to vector<4x256xf32>
    %13 = arith.mulf %10, %12 : vector<4x256xf32>
    %c1_i32 = arith.constant 1 : i32
    %14 = tpu.dynamic_rotate %0 by %c1_i32 dim 1 : vector<4x256xf32>, i32 -> vector<4x256xf32>
    %15 = vector.extract_strided_slice %1 {offsets = [3, 0], sizes = [1, 256], strides = [1, 1]} : vector<9x256xf32> to vector<1x256xf32>
    %16 = vector.broadcast %15 : vector<1x256xf32> to vector<4x256xf32>
    %17 = arith.mulf %14, %16 : vector<4x256xf32>
    %c255_i32 = arith.constant 255 : i32
    %18 = tpu.dynamic_rotate %0 by %c255_i32 dim 1 : vector<4x256xf32>, i32 -> vector<4x256xf32>
    %19 = vector.extract_strided_slice %1 {offsets = [5, 0], sizes = [1, 256], strides = [1, 1]} : vector<9x256xf32> to vector<1x256xf32>
    %20 = vector.broadcast %19 : vector<1x256xf32> to vector<4x256xf32>
    %21 = arith.mulf %18, %20 : vector<4x256xf32>
    %c241_i32 = arith.constant 241 : i32
    %22 = tpu.dynamic_rotate %0 by %c241_i32 dim 1 : vector<4x256xf32>, i32 -> vector<4x256xf32>
    %23 = vector.extract_strided_slice %1 {offsets = [6, 0], sizes = [1, 256], strides = [1, 1]} : vector<9x256xf32> to vector<1x256xf32>
    %24 = vector.broadcast %23 : vector<1x256xf32> to vector<4x256xf32>
    %25 = arith.mulf %22, %24 : vector<4x256xf32>
    %c240_i32 = arith.constant 240 : i32
    %26 = tpu.dynamic_rotate %0 by %c240_i32 dim 1 : vector<4x256xf32>, i32 -> vector<4x256xf32>
    %27 = vector.extract_strided_slice %1 {offsets = [7, 0], sizes = [1, 256], strides = [1, 1]} : vector<9x256xf32> to vector<1x256xf32>
    %28 = vector.broadcast %27 : vector<1x256xf32> to vector<4x256xf32>
    %29 = arith.mulf %26, %28 : vector<4x256xf32>
    %c239_i32 = arith.constant 239 : i32
    %30 = tpu.dynamic_rotate %0 by %c239_i32 dim 1 : vector<4x256xf32>, i32 -> vector<4x256xf32>
    %31 = vector.extract_strided_slice %1 {offsets = [8, 0], sizes = [1, 256], strides = [1, 1]} : vector<9x256xf32> to vector<1x256xf32>
    %32 = vector.broadcast %31 : vector<1x256xf32> to vector<4x256xf32>
    %33 = arith.mulf %30, %32 : vector<4x256xf32>
    %34 = tpu.concatenate %5, %9, %13, %17, %0, %21, %25, %29, %33 in 0 : vector<4x256xf32>, vector<4x256xf32>, vector<4x256xf32>, vector<4x256xf32>, vector<4x256xf32>, vector<4x256xf32>, vector<4x256xf32>, vector<4x256xf32>, vector<4x256xf32> -> vector<36x256xf32>
    %c0_3 = arith.constant 0 : index
    %c0_4 = arith.constant 0 : index
    %35 = vector.load %arg3[%c0_3, %c0_4] : memref<4x36xf32, #tpu.memory_space<vmem>>, vector<4x36xf32>
    %cst = arith.constant dense<0.000000e+00> : vector<4x256xf32>
    %36 = tpu.matmul %35, %34, %cst {dimension_numbers = #tpu.dot_dimension_numbers<[1], [0], [0], [1], [0, 0, 1, 1], [], []>} : vector<4x36xf32>, vector<36x256xf32>, vector<4x256xf32> -> vector<4x256xf32>
    %c0_5 = arith.constant 0 : index
    %c0_6 = arith.constant 0 : index
    %37 = vector.load %arg4[%c0_5, %c0_6] : memref<4x1xf32, #tpu.memory_space<vmem>>, vector<4x1xf32>
    %38 = vector.broadcast %37 : vector<4x1xf32> to vector<4x256xf32>
    %39 = arith.addf %36, %38 : vector<4x256xf32>
    %cst_7 = arith.constant 0.000000e+00 : f32
    %40 = vector.broadcast %cst_7 : f32 to vector<4x256xf32>
    %41 = arith.maximumf %39, %40 : vector<4x256xf32>
    %c17_i32_8 = arith.constant 17 : i32
    %42 = tpu.dynamic_rotate %41 by %c17_i32_8 dim 1 : vector<4x256xf32>, i32 -> vector<4x256xf32>
    %43 = vector.extract_strided_slice %1 {offsets = [0, 0], sizes = [1, 256], strides = [1, 1]} : vector<9x256xf32> to vector<1x256xf32>
    %44 = vector.broadcast %43 : vector<1x256xf32> to vector<4x256xf32>
    %45 = arith.mulf %42, %44 : vector<4x256xf32>
    %c16_i32_9 = arith.constant 16 : i32
    %46 = tpu.dynamic_rotate %41 by %c16_i32_9 dim 1 : vector<4x256xf32>, i32 -> vector<4x256xf32>
    %47 = vector.extract_strided_slice %1 {offsets = [1, 0], sizes = [1, 256], strides = [1, 1]} : vector<9x256xf32> to vector<1x256xf32>
    %48 = vector.broadcast %47 : vector<1x256xf32> to vector<4x256xf32>
    %49 = arith.mulf %46, %48 : vector<4x256xf32>
    %c15_i32_10 = arith.constant 15 : i32
    %50 = tpu.dynamic_rotate %41 by %c15_i32_10 dim 1 : vector<4x256xf32>, i32 -> vector<4x256xf32>
    %51 = vector.extract_strided_slice %1 {offsets = [2, 0], sizes = [1, 256], strides = [1, 1]} : vector<9x256xf32> to vector<1x256xf32>
    %52 = vector.broadcast %51 : vector<1x256xf32> to vector<4x256xf32>
    %53 = arith.mulf %50, %52 : vector<4x256xf32>
    %c1_i32_11 = arith.constant 1 : i32
    %54 = tpu.dynamic_rotate %41 by %c1_i32_11 dim 1 : vector<4x256xf32>, i32 -> vector<4x256xf32>
    %55 = vector.extract_strided_slice %1 {offsets = [3, 0], sizes = [1, 256], strides = [1, 1]} : vector<9x256xf32> to vector<1x256xf32>
    %56 = vector.broadcast %55 : vector<1x256xf32> to vector<4x256xf32>
    %57 = arith.mulf %54, %56 : vector<4x256xf32>
    %c255_i32_12 = arith.constant 255 : i32
    %58 = tpu.dynamic_rotate %41 by %c255_i32_12 dim 1 : vector<4x256xf32>, i32 -> vector<4x256xf32>
    %59 = vector.extract_strided_slice %1 {offsets = [5, 0], sizes = [1, 256], strides = [1, 1]} : vector<9x256xf32> to vector<1x256xf32>
    %60 = vector.broadcast %59 : vector<1x256xf32> to vector<4x256xf32>
    %61 = arith.mulf %58, %60 : vector<4x256xf32>
    %c241_i32_13 = arith.constant 241 : i32
    %62 = tpu.dynamic_rotate %41 by %c241_i32_13 dim 1 : vector<4x256xf32>, i32 -> vector<4x256xf32>
    %63 = vector.extract_strided_slice %1 {offsets = [6, 0], sizes = [1, 256], strides = [1, 1]} : vector<9x256xf32> to vector<1x256xf32>
    %64 = vector.broadcast %63 : vector<1x256xf32> to vector<4x256xf32>
    %65 = arith.mulf %62, %64 : vector<4x256xf32>
    %c240_i32_14 = arith.constant 240 : i32
    %66 = tpu.dynamic_rotate %41 by %c240_i32_14 dim 1 : vector<4x256xf32>, i32 -> vector<4x256xf32>
    %67 = vector.extract_strided_slice %1 {offsets = [7, 0], sizes = [1, 256], strides = [1, 1]} : vector<9x256xf32> to vector<1x256xf32>
    %68 = vector.broadcast %67 : vector<1x256xf32> to vector<4x256xf32>
    %69 = arith.mulf %66, %68 : vector<4x256xf32>
    %c239_i32_15 = arith.constant 239 : i32
    %70 = tpu.dynamic_rotate %41 by %c239_i32_15 dim 1 : vector<4x256xf32>, i32 -> vector<4x256xf32>
    %71 = vector.extract_strided_slice %1 {offsets = [8, 0], sizes = [1, 256], strides = [1, 1]} : vector<9x256xf32> to vector<1x256xf32>
    %72 = vector.broadcast %71 : vector<1x256xf32> to vector<4x256xf32>
    %73 = arith.mulf %70, %72 : vector<4x256xf32>
    %74 = tpu.concatenate %45, %49, %53, %57, %41, %61, %65, %69, %73 in 0 : vector<4x256xf32>, vector<4x256xf32>, vector<4x256xf32>, vector<4x256xf32>, vector<4x256xf32>, vector<4x256xf32>, vector<4x256xf32>, vector<4x256xf32>, vector<4x256xf32> -> vector<36x256xf32>
    %c0_16 = arith.constant 0 : index
    %c0_17 = arith.constant 0 : index
    %75 = vector.load %arg5[%c0_16, %c0_17] : memref<4x36xf32, #tpu.memory_space<vmem>>, vector<4x36xf32>
    %cst_18 = arith.constant dense<0.000000e+00> : vector<4x256xf32>
    %76 = tpu.matmul %75, %74, %cst_18 {dimension_numbers = #tpu.dot_dimension_numbers<[1], [0], [0], [1], [0, 0, 1, 1], [], []>} : vector<4x36xf32>, vector<36x256xf32>, vector<4x256xf32> -> vector<4x256xf32>
    %c0_19 = arith.constant 0 : index
    %c0_20 = arith.constant 0 : index
    %77 = vector.load %arg6[%c0_19, %c0_20] : memref<4x1xf32, #tpu.memory_space<vmem>>, vector<4x1xf32>
    %78 = vector.broadcast %77 : vector<4x1xf32> to vector<4x256xf32>
    %79 = arith.addf %76, %78 : vector<4x256xf32>
    %c0_21 = arith.constant 0 : index
    %80 = memref.load %arg7[%c0_21] : memref<1xf32, #tpu.memory_space<smem>>
    %81 = vector.broadcast %80 : f32 to vector<4x256xf32>
    %82 = arith.mulf %81, %79 : vector<4x256xf32>
    %c0_22 = arith.constant 0 : index
    %83 = memref.load %arg8[%c0_22] : memref<1xf32, #tpu.memory_space<smem>>
    %84 = vector.broadcast %83 : f32 to vector<4x256xf32>
    %85 = arith.mulf %84, %0 : vector<4x256xf32>
    %86 = arith.addf %82, %85 : vector<4x256xf32>
    %c0_23 = arith.constant 0 : index
    %c0_24 = arith.constant 0 : index
    %87 = vector.load %arg9[%c0_23, %c0_24] : memref<4x256xf32, #tpu.memory_space<vmem>>, vector<4x256xf32>
    tpu.vector_store %arg9[%c0_23, %c0_24], %86 {strides = array<i32>} : memref<4x256xf32, #tpu.memory_space<vmem>>, vector<4x256xf32>,
    return
  }
  func.func @transform_0(%arg0: i32) -> (i32, i32) {
    %c0_i32 = arith.constant 0 : i32
    %c0_i32_0 = arith.constant 0 : i32
    return %c0_i32, %arg0 : i32, i32
  }
  func.func @transform_1(%arg0: i32) -> (i32, i32) {
    %c0_i32 = arith.constant 0 : i32
    %c0_i32_0 = arith.constant 0 : i32
    %c0_i32_1 = arith.constant 0 : i32
    return %c0_i32, %c0_i32_0 : i32, i32
  }
  func.func @transform_2(%arg0: i32) -> (i32, i32) {
    %c0_i32 = arith.constant 0 : i32
    %c0_i32_0 = arith.constant 0 : i32
    %c0_i32_1 = arith.constant 0 : i32
    return %c0_i32, %c0_i32_0 : i32, i32
  }
  func.func @transform_3(%arg0: i32) -> (i32, i32) {
    %c0_i32 = arith.constant 0 : i32
    %c0_i32_0 = arith.constant 0 : i32
    %c0_i32_1 = arith.constant 0 : i32
    return %c0_i32, %c0_i32_0 : i32, i32
  }
  func.func @transform_4(%arg0: i32) -> (i32, i32) {
    %c0_i32 = arith.constant 0 : i32
    %c0_i32_0 = arith.constant 0 : i32
    %c0_i32_1 = arith.constant 0 : i32
    return %c0_i32, %c0_i32_0 : i32, i32
  }
  func.func @transform_5(%arg0: i32) -> (i32, i32) {
    %c0_i32 = arith.constant 0 : i32
    %c0_i32_0 = arith.constant 0 : i32
    %c0_i32_1 = arith.constant 0 : i32
    return %c0_i32, %c0_i32_0 : i32, i32
  }
  func.func @transform_6(%arg0: i32) -> i32 {
    %c0_i32 = arith.constant 0 : i32
    %c0_i32_0 = arith.constant 0 : i32
    return %c0_i32 : i32
  }
  func.func @transform_7(%arg0: i32) -> i32 {
    %c0_i32 = arith.constant 0 : i32
    %c0_i32_0 = arith.constant 0 : i32
    return %c0_i32 : i32
  }
  func.func @transform_8(%arg0: i32) -> (i32, i32) {
    %c0_i32 = arith.constant 0 : i32
    %c0_i32_0 = arith.constant 0 : i32
    return %c0_i32, %arg0 : i32, i32
  }
}

</mosaic_0001>

<bundles_post_ra>
// kernel: tpu_custom_call.1
= control target key start
LH: loop header
LB: loop body
LE: loop exit
PB: predicated region body
PF: predicated region fallthrough
CT: control target
= control target key end

     0   :  { %s1555_s0 = inlined_call_operand.vmem [shape: f32[4,512], index: 0, kind: input, shape index: {}]   ;;  %s1556_s1 = inlined_call_operand.hbm [shape: f32[9,256], index: 1, kind: input, shape index: {}]   ;;  %s1557_s2 = inlined_call_operand.vmem [shape: f32[4,36], index: 2, kind: input, shape index: {}]   ;;  %s1558_s3 = inlined_call_operand.vmem [shape: f32[4,1], index: 3, kind: input, shape index: {}]   ;;  %s1559_s4 = inlined_call_operand.vmem [shape: f32[4,36], index: 4, kind: input, shape index: {}]   ;;  %s1560_s5 = inlined_call_operand.vmem [shape: f32[4,1], index: 5, kind: input, shape index: {}]   ;;  %s1561_s6 = inlined_call_operand.<no memory space> [shape: f32[1], index: 6, kind: input, shape index: {}]   ;;  %s1562_s7 = inlined_call_operand.<no memory space> [shape: f32[1], index: 7, kind: input, shape index: {}]   ;;  %s1563_s8 = inlined_call_operand.hbm [shape: f32[4,512], index: 8, kind: output, shape index: {}]  }
   0x1   :  { %13 = sst [smem:[#allocation2]] %s1561_s6 }
   0x2   :  { %14 = sst [smem:[#allocation3]] %s1562_s7 }
   0x3   :  { %15 = vsyncpa [#allocation5], 0 }
   0x4   :  { %16 = vsyncpa [#allocation6], 0 }
   0x5   :  { %18 = vsyncpa [#allocation6 + $0x1], 0  ;;  %s1143_s9 = smov 0   ;;  %s1145_s10 = smov 0  }
   0x6   :  { %s1147_s11 = smov 0   ;;  %s1149_s12 = smov 0  }
   0x7 LB: > { %s1164_s6 = sadd.s32 4294967295, %s1076_s12   ;;  %s879_s7 = sadd.s32 4294967294, %s1076_s12   ;;  %s1076_s12 = sphi %s1149_s12, %s1579_s12   ;;  %s1072_s11 = sphi %s1147_s11, %s1578_s11   ;;  %s1068_s10 = sphi %s1145_s10, %s1577_s10   ;;  %s1064_s9 = sphi %s1143_s9, %s1576_s9  }
   0x8   : > { %s1168_s13 = sadd.s32 1, %s1076_s12   ;;  %s204_s14 = sadd.s32 1, %s1072_s11 }
   0x9   : > { %s201_s15 = ssub.s32 %s1076_s12, %s1168_s13  ;;  %p214_p0 = scmp.ne.s32.totalorder %s1072_s11, %s1068_s10 }
   0xa   : > { %p202_p1 = scmp.eq.s32.totalorder %s201_s15, 0  ;;  %p215_p2 = scmp.eq.s32.totalorder %s1164_s6, 1 }
   0xb   : > { %p220_p3 = scmp.ne.s32.totalorder %s1068_s10, %s1064_s9  ;;  %p221_p4 = scmp.eq.s32.totalorder %s879_s7, 1 }
   0xc   : > { %s1179_s16 = scalar_select %p202_p1, %s1072_s11, %s204_s14  }
   0xd   : > { %p1181_p5 = por %p215_p2, %p214_p0  ;;  %p1185_p6 = por %p221_p4, %p220_p3 }
   0xe   : > { %p880_p7 = scmp.ge.s32.totalorder %s1076_s12, 1  ;;  %p228_p8 = scmp.lt.s32.totalorder %s1076_s12, 3 }
   0xf   : > { %s1567_s17 = scalar_select %p1181_p5, 1, 0 }
  0x10   : > { %s1568_s18 = scalar_select %p1185_p6, 1, 0 }
  0x11   : > { %p1564_p9 = scmp.eq.s32.totalorder %s1164_s6, 0  ;;  %p1192_p10 = pnand %p880_p7, %p228_p8 }
  0x12   : > { %s1078_s20 = smov [#allocation4]   ;;  %s982_s25 = scalar_lea.hbm %s1556_s1, 512 }
  0x13   : > { %s1569_s19 = scalar_select %p1192_p10, 1, 0 }
  0x14   : > { %s240_s21 = sshll.u32 %s1078_s20, 4  ;;  %p924_p11 = pneg %p1192_p10  ;;  %s241_s21 = int_to_ptr.vmem [resolvable:$true] %s240_s21 }
  0x15   : > { %p983_p13 = scmp.ne.s32.totalorder %s1556_s1, %s982_s25  ;;  %p989_p3 = scmp.lt.u32.totalorder %s982_s25, %s1556_s1 }
  0x16   : > { %p1200_p12 = pnand %p1564_p9, %p924_p11 }
  0x18   : > { %p984_p0 = pneg %p1200_p12 }
  0x1a   : > { %p985_p1 = pnand %p984_p0, %p983_p13 }
  0x1c   : > { %p986_p2 = pneg %p985_p1 }
  0x1e   : > { %p991_p4 = pnand %p989_p3, %p986_p2 }
  0x20   : > { %994 = shalt.err (!%p991_p4)
}
  0x21   : > { %s995_s30 = scalar_lea.vmem %s241_s21, 512  ;;  %p1003_p9 = scmp.lt.s32.totalorder %s241_s21, %s241_s21 }
  0x22   : > { %p996_p7 = scmp.ne.s32.totalorder %s241_s21, %s995_s30  ;;  %p1004_p6 = scmp.lt.s32.totalorder %s995_s30, %s995_s30 }
  0x24   : > { %p998_p8 = pnand %p996_p7, %p984_p0  ;;  %p1005_p5 = por %p1004_p6, %p1003_p9 }
  0x26   : > { %p999_p11 = pneg %p998_p8 }
  0x28   : > { %p1006_p10 = pnand %p1005_p5, %p999_p11 }
  0x2a   : > { %1009 = shalt.err (!%p1006_p10)
}
  0x2b   : > { %s1079_s7 = smov 256   ;;  %s1080_s14 = smov 16  }
  0x2c   : > { %927 = dma.hbm_to_vmem [thread:$0]  (!%p1200_p12), %s1556_s1, 512, %s241_s21, [#allocation5], %s1079_s7, %s1079_s7, %s1080_s14  }
  0x2d   : > { %p1571_p13 = scmp.ne.s32.totalorder %s1569_s19, 0 }
  0x2e   : > { %p1572_p1 = scmp.eq.s32.totalorder (!%p1571_p13), %s1164_s6, 0 }
  0x2f   : > { %283 = sbr.rel (%p1571_p13) target bundleno = 819 (0x333), region = 52 }
  0x36   : > { %1055 = dma.done.wait (%p1572_p1), [#allocation5], 512   ;;  %p1573_p0 = pmov %p1572_p1 }
  0x37   : > { %s886_s23 = sshll.u32 %s1164_s6, 1  ;;  %s1081_s21 = smov 1   ;;  %v1087_v2 = vmov 0.0   ;;  %v1089_v3 = vmov 0   ;;  %v504_v4 = vld [vmem:[%s1558_s3] sm:$0xf]  ;;  %v336_v5 = vlaneseq }
  0x38   : > { %1057 = vsyncadd (%p1573_p0), [#allocation5], 4294966784  ;;  %p318_p5 = scmp.lt.s32.totalorder %s886_s23, 3  ;;  %s1082_s19 = smov 16   ;;  %584 = vmatprep.mubr.f32.mxu0 %v1087_v2  ;;  %769 = vmatprep.mubr.f32.mxu1 %v1087_v2  ;;  %v1276_v11 = vld [vmem:[#allocation4] sm:$0xff]  ;;  %v1278_v12 = vld [vmem:[#allocation4 + $0x8] sm:$0xff] }
  0x39   : > { %s1083_s27 = smov 17   ;;  %s1084_s28 = smov 15   ;;  %980 = vset.pattern.permute.xlu0 %v1089_v3  ;;  %v1271_v6 = vshrl.u32 %v336_v5, 7  ;;  %v1273_v7 = vand.u32 127, %v336_v5  ;;  %vm494_vm4 = vcmask 1043456   ;;  %vm510_vm9 = vcmask 293888  }
  0x3a   : > { %s1581_s23 = smov (!%p318_p5, %s886_s23), 3  ;;  %s1085_s29 = smov 127  }
  0x3b   : > { %s887_s24 = sshll.u32 %s1581_s23, 2  ;;  %s1086_s30 = smov 112   ;;  %v394_v10 = vsub.s32 3, %v1271_v6  ;;  %v360_v13 = vsub.s32 1, %v1271_v6  ;;  %vm389_vm0 = vcmp.lt.s32.totalorder %v1273_v7, 1  ;;  %v343_v16 = vsub.s32 0, %v1271_v6 }
  0x3c   : > { %s321_s26 = scalar_lea.vmem %s1555_s0, %s887_s24  ;;  %s1088_s7 = smov 113   ;;  %vm355_vm1 = vcmp.lt.s32.totalorder %v1273_v7, 16  ;;  %v377_v19 = vsub.s32 2, %v1271_v6  ;;  %vm338_vm2 = vcmp.lt.s32.totalorder %v1273_v7, 17  ;;  %vm372_vm3 = vcmp.lt.s32.totalorder %v1273_v7, 15 }
  0x3d   : > { %v1230_v0 = vld [vmem:[%s321_s26] sm:$0xff]  ;;  %s1090_s14 = smov 111   ;;  %v1284_v17 = vrot.slane %v1276_v11, %v394_v10  ;;  %v1287_v18 = vrot.slane %v1278_v12, %v394_v10  ;;  %v1296_v22 = vrot.slane %v1276_v11, %v360_v13  ;;  %v1299_v23 = vrot.slane %v1278_v12, %v360_v13  ;;  %p1574_p9 = scmp.ne.s32.totalorder %s1567_s17, 0 }
  0x3e   : > { %385 = vrot.lane.b32.xlu1 %v1230_v0, %s1081_s21  ;;  %351 = vrot.lane.b32.xlu0 %v1230_v0, %s1082_s19  ;;  %v1238_v1 = vcombine.high %v1230_v0, %v1230_v0  ;;  %v1303_v24 = vrot.slane %v1276_v11, %v343_v16  ;;  %v1306_v25 = vrot.slane %v1278_v12, %v343_v16  ;;  %v411_v38 = vsub.s32 5, %v1271_v6 }
  0x3f   : > { %v1318_v34 = vrot.slane %v1276_v11, %v377_v19  ;;  %v1321_v35 = vrot.slane %v1278_v12, %v377_v19  ;;  %vm406_vm5 = vcmp.lt.s32.totalorder %v1273_v7, 127  ;;  %v445_v43 = vsub.s32 7, %v1271_v6 }
  0x40   : > { %v1339_v52 = vrot.slane %v1276_v11, %v411_v38  ;;  %v1342_v53 = vrot.slane %v1278_v12, %v411_v38  ;;  %vm440_vm6 = vcmp.lt.s32.totalorder %v1273_v7, 112  ;;  %vm423_vm7 = vcmp.lt.s32.totalorder %v1273_v7, 113 }
  0x41   : > { %v1354_v2 = vrot.slane %v1276_v11, %v445_v43  ;;  %v1357_v3 = vrot.slane %v1278_v12, %v445_v43  ;;  %vm457_vm8 = vcmp.lt.s32.totalorder %v1273_v7, 111 }
  0x42   : > { %332 = vrot.lane.b32.xlu0 %v1230_v0, %s1083_s27  ;;  %387 = vrot.lane.b32.xlu1 %v1238_v1, %s1081_s21 }
  0x46   : > { %334 = vrot.lane.b32.xlu1 %v1238_v1, %s1083_s27  ;;  %353 = vrot.lane.b32.xlu0 %v1238_v1, %s1082_s19 }
  0x4a   : > { %370 = vrot.lane.b32.xlu1 %v1238_v1, %s1084_s28  ;;  %368 = vrot.lane.b32.xlu0 %v1230_v0, %s1084_s28 }
  0x4e   : > { %404 = vrot.lane.b32.xlu1 %v1238_v1, %s1085_s29  ;;  %402 = vrot.lane.b32.xlu0 %v1230_v0, %s1085_s29 }
  0x52   : > { %438 = vrot.lane.b32.xlu1 %v1238_v1, %s1086_s30  ;;  %436 = vrot.lane.b32.xlu0 %v1230_v0, %s1086_s30 }
  0x56   : > { %421 = vrot.lane.b32.xlu1 %v1238_v1, %s1088_s7  ;;  %419 = vrot.lane.b32.xlu0 %v1230_v0, %s1088_s7 }
  0x5a   : > { %455 = vrot.lane.b32.xlu1 %v1238_v1, %s1090_s14  ;;  %453 = vrot.lane.b32.xlu0 %v1230_v0, %s1090_s14 }
  0x5e   : > { %507 = vperm.xlu0 %980, %v504_v4   ;;  %v428_v4 = vsub.s32 6, %v1271_v6 }
  0x60   : > { %v1370_v16 = vrot.slane %v1276_v11, %v428_v4  ;;  %v1373_v19 = vrot.slane %v1278_v12, %v428_v4  ;;  %v1382_v12 = vld [vmem:[#allocation4 + $0x18] ss:$0 sm:$0xff] }
  0xb0   : > { %v386_v8 = vpop.permute.xlu1 %385  ;;  %v352_v9 = vpop.permute.xlu0 %351 }
  0xb4   : > { %v333_v14 = vpop.permute.xlu0 %332  ;;  %v388_v15 = vpop.permute.xlu1 %387 }
  0xb5   : > { %v390_v20 = vsel %vm389_vm0, %v386_v8, %v388_v15  ;;  %v391_v21 = vsel %vm389_vm0, %v388_v15, %v386_v8 }
  0xb6   : > { %v400_v28 = vmul.f32 %v1284_v17, %v391_v21  ;;  %v401_v29 = vmul.f32 %v1287_v18, %v390_v20 }
  0xb8   : > { %v335_v26 = vpop.permute.xlu1 %334  ;;  %v354_v27 = vpop.permute.xlu0 %353  ;;  %v478_v44 = vrot.slane %v400_v28, 4  ;;  %v479_v45 = vrot.slane %v401_v29, 4 }
  0xb9   : > { %v356_v30 = vsel %vm355_vm1, %v352_v9, %v354_v27  ;;  %v357_v31 = vsel %vm355_vm1, %v354_v27, %v352_v9  ;;  %v339_v36 = vsel %vm338_vm2, %v333_v14, %v335_v26  ;;  %v340_v37 = vsel %vm338_vm2, %v335_v26, %v333_v14 }
  0xba   : > { %v366_v32 = vmul.f32 %v1296_v22, %v357_v31  ;;  %v367_v33 = vmul.f32 %v1299_v23, %v356_v30  ;;  %v349_v48 = vmul.f32 %v1303_v24, %v340_v37  ;;  %v350_v49 = vmul.f32 %v1306_v25, %v339_v36 }
  0xbc   : > { %v472_v39 = vrot.slane %v366_v32, 4  ;;  %v473_v40 = vrot.slane %v367_v33, 4  ;;  %v371_v41 = vpop.permute.xlu1 %370  ;;  %v369_v42 = vpop.permute.xlu0 %368 }
  0xbd   : > { %v373_v46 = vsel %vm372_vm3, %v369_v42, %v371_v41  ;;  %v374_v47 = vsel %vm372_vm3, %v371_v41, %v369_v42  ;;  %v1390_v42 = vld [vmem:[#allocation4 + $0x10] ss:$0 sm:$0xff] }
  0xbe   : > { %v383_v50 = vmul.f32 %v1318_v34, %v374_v47  ;;  %v384_v51 = vmul.f32 %v1321_v35, %v373_v46  ;;  %v496_v56 = vsel %vm494_vm4, %v350_v49, %v473_v40  ;;  %v495_v58 = vsel %vm494_vm4, %v349_v48, %v472_v39  ;;  %v503_v47 = vld [vmem:[%s1557_s2] sm:$0xf] }
  0xc0   : > { %v405_v54 = vpop.permute.xlu1 %404  ;;  %v403_v55 = vpop.permute.xlu0 %402  ;;  %v498_v57 = vsel %vm494_vm4, %v384_v51, %v479_v45  ;;  %v497_v59 = vsel %vm494_vm4, %v383_v50, %v478_v44 }
  0xc1   : > { %v407_v60 = vsel %vm406_vm5, %v403_v55, %v405_v54  ;;  %v408_v61 = vsel %vm406_vm5, %v405_v54, %v403_v55  ;;  %v902_v62 = vpack.c.bf16 %v498_v57, %v496_v56  ;;  %v904_v63 = vpack.c.bf16 %v497_v59, %v495_v58  ;;  %v690_v57 = vld [vmem:[%s1560_s5] sm:$0xf] }
  0xc2   : > { %v417_v5 = vmul.f32 %v1339_v52, %v407_v60  ;;  %v418_v8 = vmul.f32 %v1342_v53, %v408_v61 }
  0xc3   : > { %903 = vmatprep.subr.bf16.mxu0 %v902_v62 }
  0xc4   : > { %v439_v9 = vpop.permute.xlu1 %438  ;;  %905 = vmatpush1.bf16.msra.mxu0 %v904_v63  ;;  %v437_v10 = vpop.permute.xlu0 %436  ;;  %v484_v20 = vrot.slane %v417_v5, 4  ;;  %v485_v21 = vrot.slane %v418_v8, 4 }
  0xc5   : > { %v441_v13 = vsel %vm440_vm6, %v437_v10, %v439_v9  ;;  %v442_v14 = vsel %vm440_vm6, %v439_v9, %v437_v10 }
  0xc6   : > { %v451_v15 = vmul.f32 %v1354_v2, %v441_v13  ;;  %v452_v6 = vmul.f32 %v1357_v3, %v442_v14  ;;  %v500_v36 = vsel %vm494_vm4, %v1238_v1, %v485_v21  ;;  %v499_v39 = vsel %vm494_vm4, %v1230_v0, %v484_v20 }
  0xc8   : > { %v422_v26 = vpop.permute.xlu1 %421  ;;  %v420_v27 = vpop.permute.xlu0 %419  ;;  %v490_v30 = vrot.slane %v451_v15, 4  ;;  %v491_v31 = vrot.slane %v452_v6, 4 }
  0xc9   : > { %v424_v28 = vsel %vm423_vm7, %v420_v27, %v422_v26  ;;  %v425_v29 = vsel %vm423_vm7, %v422_v26, %v420_v27 }
  0xca   : > { %v434_v11 = vmul.f32 %v1370_v16, %v424_v28  ;;  %v435_v32 = vmul.f32 %v1373_v19, %v425_v29 }
  0xcc   : > { %v456_v33 = vpop.permute.xlu1 %455  ;;  %v502_v37 = vsel %vm494_vm4, %v435_v32, %v491_v31  ;;  %v454_v38 = vpop.permute.xlu0 %453  ;;  %v501_v40 = vsel %vm494_vm4, %v434_v11, %v490_v30 }
  0xcd   : > { %v906_v41 = vpack.c.bf16 %v502_v37, %v500_v36  ;;  %v458_v43 = vsel %vm457_vm8, %v454_v38, %v456_v33  ;;  %v459_v44 = vsel %vm457_vm8, %v456_v33, %v454_v38  ;;  %v908_v45 = vpack.c.bf16 %v501_v40, %v499_v39 }
  0xce   : > { %v469_v1 = vmul.f32 %v1382_v12, %v459_v44  ;;  %v468_v46 = vmul.f32 %v1390_v42, %v458_v43 }
  0xcf   : > { %907 = vmatprep.subr.bf16.mxu0 %v906_v41 }
  0xd0   : > { %909 = vmatpush1.bf16.msra.mxu0 %v908_v45 }
  0xd1   : > { %890 = vmatprep.subr.msk.mxu0 %vm494_vm4, %v469_v1 }
  0xd4   : > { %891 = vmatpush1.msk.msra.mxu0 %vm494_vm4, %v468_v46 }
  0xd5   : > { %892 = vmatmul.mubr.msk.f32.vlgmr.msra.gmra.mrb[0].mxu0 %vm510_vm9, %v503_v47 }
  0xdd   : > { %v508_v48 = vpop.permute.xlu0 %507 }
 0x1a8   : > { %v586_v49 = vpop.f32.mrb[0].mxu0 }
 0x1a9   : > { %v587_v50 = vadd.f32 %v586_v49, %v508_v48  ;;  %v588_v51 = vpop.f32.mrb[1].mxu0 }
 0x1aa   : > { %v589_v55 = vadd.f32 %v588_v51, %v508_v48 }
 0x1ab   : > { %v1404_v54 = vmax.f32 %v587_v50, 0.0 }
 0x1ac   : > { %v1410_v56 = vmax.f32 %v589_v55, 0.0 }
 0x1ad   : > { %617 = vrot.lane.b32.xlu0 %v1404_v54, %s1081_s21  ;;  %601 = vrot.lane.b32.xlu1 %v1404_v54, %s1082_s19 }
 0x1b1   : > { %593 = vrot.lane.b32.xlu0 %v1404_v54, %s1083_s27  ;;  %603 = vrot.lane.b32.xlu1 %v1410_v56, %s1082_s19  ;;  %s780_s19 = sld [smem:[#allocation3]] }
 0x1b5   : > { %609 = vrot.lane.b32.xlu0 %v1404_v54, %s1084_s28  ;;  %619 = vrot.lane.b32.xlu1 %v1410_v56, %s1081_s21 }
 0x1b9   : > { %625 = vrot.lane.b32.xlu0 %v1404_v54, %s1085_s29  ;;  %595 = vrot.lane.b32.xlu1 %v1410_v56, %s1083_s27  ;;  %s776_s27 = sld [smem:[#allocation2]] }
 0x1bd   : > { %641 = vrot.lane.b32.xlu0 %v1404_v54, %s1086_s30  ;;  %611 = vrot.lane.b32.xlu1 %v1410_v56, %s1084_s28  ;;  %s314_s28 = sand.u32 1, %s1068_s10  }
 0x1be   : > { %s794_s24 = scalar_lea.sflag [#allocation6], %s314_s28 }
 0x1c1   : > { %633 = vrot.lane.b32.xlu0 %v1404_v54, %s1088_s7  ;;  %627 = vrot.lane.b32.xlu1 %v1410_v56, %s1085_s29  ;;  %s885_s29 = sshll.u32 %s314_s28, 3 }
 0x1c5   : > { %649 = vrot.lane.b32.xlu0 %v1404_v54, %s1090_s14  ;;  %643 = vrot.lane.b32.xlu1 %v1410_v56, %s1086_s30  ;;  %s901_s30 = sshll.u32 %s1164_s6, 7  ;;  %s1091_s6 = smov [#allocation7]  }
 0x1c6   : > { %s1513_s23 = scalar_lea.hbm %s1563_s8, %s901_s30  ;;  %s1014_s22 = sshll.u32 %s1091_s6, 4  ;;  %s1015_s22 = int_to_ptr.vmem [resolvable:$false] %s1014_s22 }
 0x1c7   : > { %s1016_s26 = scalar_lea.vmem %s1015_s22, 256 }
 0x1c9   : > { %693 = vperm.xlu0 %980, %v690_v57   ;;  %635 = vrot.lane.b32.xlu1 %v1410_v56, %s1088_s7  ;;  %s316_s7 = scalar_lea.vmem [#allocation7], %s885_s29 }
 0x1cd   : > { %651 = vrot.lane.b32.xlu1 %v1410_v56, %s1090_s14  ;;  %s808_s14 = sshll.u32 %s316_s7, 4  ;;  %s1515_s14 = int_to_ptr.vmem [resolvable:$true] %s808_s14 }
 0x1ce   : > { %s1010_s25 = scalar_lea.vmem %s1515_s14, 128  ;;  %p1017_p2 = scmp.lt.s32.totalorder %s1515_s14, %s1015_s22 }
 0x1cf   : > { %p1011_p6 = scmp.ne.s32.totalorder %s1515_s14, %s1010_s25  ;;  %p1018_p3 = scmp.lt.s32.totalorder %s1016_s26, %s1010_s25 }
 0x1d1   : > { %p1012_p10 = pnand %p1011_p6, %p1574_p9  ;;  %p1019_p4 = por %p1018_p3, %p1017_p2 }
 0x1d3   : > { %p1013_p12 = pneg %p1012_p10 }
 0x1d5   : > { %p1020_p7 = pnand %p1019_p4, %p1013_p12 }
 0x21f   : > { %v618_v58 = vpop.permute.xlu0 %617  ;;  %v602_v59 = vpop.permute.xlu1 %601 }
 0x223   : > { %v594_v60 = vpop.permute.xlu0 %593  ;;  %v604_v61 = vpop.permute.xlu1 %603 }
 0x224   : > { %v605_v4 = vsel %vm355_vm1, %v602_v59, %v604_v61  ;;  %v606_v5 = vsel %vm355_vm1, %v604_v61, %v602_v59 }
 0x225   : > { %v607_v13 = vmul.f32 %v606_v5, %v1296_v22  ;;  %v608_v14 = vmul.f32 %v605_v4, %v1299_v23 }
 0x227   : > { %v610_v62 = vpop.permute.xlu0 %609  ;;  %v620_v63 = vpop.permute.xlu1 %619  ;;  %v659_v30 = vrot.slane %v607_v13, 4  ;;  %v660_v22 = vrot.slane %v608_v14, 4  ;;  %v777_v13 = vstv %s776_s27 }
 0x228   : > { %v621_v8 = vsel %vm389_vm0, %v618_v58, %v620_v63  ;;  %v622_v9 = vsel %vm389_vm0, %v620_v63, %v618_v58 }
 0x229   : > { %v623_v20 = vmul.f32 %v622_v9, %v1284_v17  ;;  %v624_v21 = vmul.f32 %v621_v8, %v1287_v18 }
 0x22b   : > { %v596_v10 = vpop.permute.xlu1 %595  ;;  %v626_v26 = vpop.permute.xlu0 %625  ;;  %v665_v11 = vrot.slane %v623_v20, 4  ;;  %v666_v32 = vrot.slane %v624_v21, 4 }
 0x22c   : > { %v597_v15 = vsel %vm338_vm2, %v594_v60, %v596_v10  ;;  %v598_v6 = vsel %vm338_vm2, %v596_v10, %v594_v60 }
 0x22d   : > { %v599_v27 = vmul.f32 %v598_v6, %v1303_v24  ;;  %v600_v28 = vmul.f32 %v597_v15, %v1306_v25 }
 0x22f   : > { %v612_v29 = vpop.permute.xlu1 %611  ;;  %v642_v33 = vpop.permute.xlu0 %641  ;;  %v682_v24 = vsel %vm494_vm4, %v600_v28, %v660_v22  ;;  %v681_v37 = vsel %vm494_vm4, %v599_v27, %v659_v30 }
 0x230   : > { %v613_v23 = vsel %vm372_vm3, %v610_v62, %v612_v29  ;;  %v614_v31 = vsel %vm372_vm3, %v612_v29, %v610_v62 }
 0x231   : > { %v615_v17 = vmul.f32 %v614_v31, %v1318_v34  ;;  %v616_v18 = vmul.f32 %v613_v23, %v1321_v35 }
 0x233   : > { %v628_v36 = vpop.permute.xlu1 %627  ;;  %v684_v25 = vsel %vm494_vm4, %v616_v18, %v666_v32  ;;  %v683_v38 = vsel %vm494_vm4, %v615_v17, %v665_v11  ;;  %v634_v46 = vpop.permute.xlu0 %633 }
 0x234   : > { %v629_v39 = vsel %vm406_vm5, %v626_v26, %v628_v36  ;;  %v630_v40 = vsel %vm406_vm5, %v628_v36, %v626_v26  ;;  %v910_v41 = vpack.c.bf16 %v684_v25, %v682_v24  ;;  %v912_v34 = vpack.c.bf16 %v683_v38, %v681_v37 }
 0x235   : > { %v631_v35 = vmul.f32 %v629_v39, %v1339_v52  ;;  %v632_v43 = vmul.f32 %v630_v40, %v1342_v53 }
 0x236   : > { %911 = vmatprep.subr.bf16.mxu1 %v910_v41 }
 0x237   : > { %913 = vmatpush1.bf16.msra.mxu1 %v912_v34  ;;  %v644_v44 = vpop.permute.xlu1 %643  ;;  %v671_v49 = vrot.slane %v631_v35, 4  ;;  %v672_v50 = vrot.slane %v632_v43, 4  ;;  %v650_v60 = vpop.permute.xlu0 %649 }
 0x238   : > { %v645_v45 = vsel %vm440_vm6, %v642_v33, %v644_v44  ;;  %v646_v1 = vsel %vm440_vm6, %v644_v44, %v642_v33 }
 0x239   : > { %v647_v47 = vmul.f32 %v645_v45, %v1354_v2  ;;  %v648_v48 = vmul.f32 %v646_v1, %v1357_v3  ;;  %v686_v2 = vsel %vm494_vm4, %v1410_v56, %v672_v50  ;;  %v685_v62 = vsel %vm494_vm4, %v1404_v54, %v671_v49  ;;  %v689_v54 = vld [vmem:[%s1559_s4] sm:$0xf] }
 0x23b   : > { %v636_v51 = vpop.permute.xlu1 %635  ;;  %v677_v55 = vrot.slane %v647_v47, 4  ;;  %v678_v57 = vrot.slane %v648_v48, 4 }
 0x23c   : > { %v637_v52 = vsel %vm423_vm7, %v634_v46, %v636_v51  ;;  %v638_v53 = vsel %vm423_vm7, %v636_v51, %v634_v46 }
 0x23d   : > { %v639_v58 = vmul.f32 %v637_v52, %v1370_v16  ;;  %v640_v59 = vmul.f32 %v638_v53, %v1373_v19 }
 0x23f   : > { %v652_v61 = vpop.permute.xlu1 %651  ;;  %v688_v3 = vsel %vm494_vm4, %v640_v59, %v678_v57  ;;  %v687_v63 = vsel %vm494_vm4, %v639_v58, %v677_v55 }
 0x240   : > { %v654_v4 = vsel %vm457_vm8, %v652_v61, %v650_v60  ;;  %v914_v5 = vpack.c.bf16 %v688_v3, %v686_v2  ;;  %v916_v16 = vpack.c.bf16 %v687_v63, %v685_v62  ;;  %v653_v8 = vsel %vm457_vm8, %v650_v60, %v652_v61 }
 0x241   : > { %v656_v19 = vmul.f32 %v1382_v12, %v654_v4  ;;  %v655_v56 = vmul.f32 %v1390_v42, %v653_v8  ;;  %v781_v12 = vstv %s780_s19 }
 0x242   : > { %915 = vmatprep.subr.bf16.mxu1 %v914_v5  ;;  %v782_v7 = vmul.f32 %v781_v12, %v1230_v0 }
 0x243   : > { %917 = vmatpush1.bf16.msra.mxu1 %v916_v16 }
 0x244   : > { %893 = vmatprep.subr.msk.mxu1 %vm494_vm4, %v656_v19  ;;  %v784_v6 = vcombine.high %v782_v7, %v782_v7 }
 0x247   : > { %894 = vmatpush1.msk.msra.mxu1 %vm494_vm4, %v655_v56 }
 0x248   : > { %895 = vmatmul.mubr.msk.f32.vlgmr.msra.gmra.mrb[0].mxu1 %vm510_vm9, %v689_v54  ;;  %v694_v9 = vpop.permute.xlu0 %693 }
 0x31b   : > { %v771_v10 = vpop.f32.mrb[0].mxu1 }
 0x31c   : > { %v772_v42 = vadd.f32 %v771_v10, %v694_v9  ;;  %v773_v14 = vpop.f32.mrb[1].mxu1 }
 0x31d   : > { %v774_v15 = vadd.f32 %v773_v14, %v694_v9 }
 0x31e   : > { %v778_v20 = vmul.f32 %v777_v13, %v772_v42 }
 0x31f   : > { %v779_v21 = vmul.f32 %v777_v13, %v774_v15 }
 0x320   : > { %v786_v26 = vadd.f32 %v782_v7, %v778_v20 }
 0x321   : > { %v787_v27 = vadd.f32 %v784_v6, %v779_v21 }
 0x323   : > { %v790_v28 = vcombine.low %v786_v26, %v787_v27 }
 0x325   : > { %792 = vst [vmem:[%s316_s7] sm:$0xff] %v790_v28 }
 0x326   : > { %1023 = shalt.err (!%p1020_p7)
}
 0x327   : > { %s1024_s21 = scalar_lea.hbm %s1513_s23, 128  ;;  %s1028_s28 = scalar_lea.hbm %s1563_s8, 256 }
 0x328   : > { %p1025_p8 = scmp.ne.s32.totalorder %s1513_s23, %s1024_s21  ;;  %p1029_p1 = scmp.lt.u32.totalorder %s1513_s23, %s1563_s8 }
 0x329   : > { %p1030_p0 = scmp.lt.u32.totalorder %s1028_s28, %s1024_s21  ;;  %p1032_p6 = scmp.lt.u32.totalorder %s1024_s21, %s1513_s23 }
 0x32a   : > { %p1026_p11 = pnand %p1025_p8, %p1574_p9 }
 0x32b   : > { %p1031_p5 = por %p1030_p0, %p1029_p1 }
 0x32c   : > { %p1027_p13 = pneg %p1026_p11 }
 0x32d   : > { %p1033_p10 = por %p1032_p6, %p1031_p5 }
 0x32f   : > { %p1034_p12 = pnand %p1033_p10, %p1027_p13 }
 0x331   : > { %1037 = shalt.err (!%p1034_p12)
}
 0x332   : > { %922 = dma.vmem_to_hbm [thread:$0]  (%p1574_p9), %s1515_s14, 128, %s1513_s23, %s794_s24  }
 0x333 PF: > { %p934_p2 = scmp.ge.s32.totalorder %s1076_s12, 2  ;;  %s820_s7 = sand.u32 1, %s1064_s9  }
 0x334   : > { %p1575_p3 = scmp.ne.s32.totalorder %s1568_s18, 0  ;;  %s821_s15 = scalar_lea.sflag [#allocation6], %s820_s7 }
 0x336   : > { %p929_p4 = pnand %p934_p2, %p1575_p3 }
 0x338   : > { %1059 = dma.done.wait (!%p929_p4), %s821_s15, 128  }
 0x339   : > { %1061 = vsyncadd (!%p929_p4), %s821_s15, 4294967168  ;;  %p21_p7 = scmp.ge.s32.totalorder %s1168_s13, 4   ;;  %s1576_s9 = smov %s1068_s10 }
 0x33a   : > { %s1577_s10 = smov %s1072_s11  ;;  %s1578_s11 = smov %s1179_s16 }
 0x33b   : > { %s1579_s12 = smov %s1168_s13  ;;  %23 = sbr.rel (!%p21_p7) target bundleno = 7 (0x7), region = 92 }
 0x342   :  { %826 = vsyncpa [#allocation5], 1 }
 0x343   :  { %828 = vsyncpa [#allocation5 + $0x1], 1 }
 0x344   :  { %829 = vsyncpa [#allocation6], 1 }
 0x345   :  { %831 = vsyncpa [#allocation6 + $0x1], 1 }

</bundles_post_ra>
